<compile_context>
chip_gen: v7x
topology: tpu7x:2x2x1
jax: 0.10.0
libtpu: 0.0.40
codegen_flags: <defaults>
</compile_context>

<pallas_src>
import math

import jax
import jax.numpy as jnp
from jax.experimental import pallas as pl
from jax.experimental.pallas import tpu as pltpu


_INV_SQRT2 = 1.0 / math.sqrt(2.0)


def _erf_f32(z):
    # Abramowitz & Stegun 7.1.26 rational approximation, |err| <= 1.5e-7.
    # Uses only VPU ops + one EUP exp, so it lowers cleanly in Mosaic
    # (no dependence on a native erf primitive).
    p = 0.3275911
    a1, a2, a3, a4, a5 = (0.254829592, -0.284496736, 1.421413741,
                          -1.453152027, 1.061405429)
    az = jnp.abs(z)
    t = 1.0 / (1.0 + p * az)
    poly = t * (a1 + t * (a2 + t * (a3 + t * (a4 + t * a5))))
    e = 1.0 - poly * jnp.exp(-az * az)
    return jnp.where(z < 0.0, -e, e)


def _gelu_f32(y):
    # Exact (erf-based) GELU, matching the PyTorch reference:
    #   x * 0.5 * (1 + erf(x / sqrt(2)))
    return y * 0.5 * (1.0 + _erf_f32(y * _INV_SQRT2))


def _intermediate_kernel(x_ref, w_ref, b_ref, o_ref):
    # Block views: x_ref (tm, H), w_ref (H, tn), b_ref (1, tn), o_ref (tm, tn).
    # Feed operands in their stored dtype (bf16 stays bf16 for full-rate MXU);
    # accumulate and do the activation math in f32, cast once on the store.
    acc = jnp.dot(x_ref[...], w_ref[...], preferred_element_type=jnp.float32)
    acc = acc + b_ref[...].astype(jnp.float32)       # (1, tn) broadcasts over rows
    o_ref[...] = _gelu_f32(acc).astype(o_ref.dtype)  # one lane-dense (tm, tn) store


def bert_intermediate(hidden_states, weight, bias, *, block_m=256, block_n=512):
    """hidden_states: (B, S, H); weight: (H, I) input-major; bias: (I,)."""
    B, S, H = hidden_states.shape
    Hw, I = weight.shape
    assert Hw == H
    M = B * S

    # Flatten (B, S, H) -> (M, H): one big lane-dense GEMM instead of per-batch work.
    x2 = hidden_states.reshape(M, H)
    b2 = bias.reshape(1, I)

    # Tile M and the output (intermediate) dim; keep the full K=H per tile
    # (H is small — 768/1024 in real BERT — so a (tm, H) + (H, tn) pair of
    # blocks stays well inside the default scoped-VMEM budget even on v7x).
    tm = M if M <= block_m else block_m
    tn = I if I <= block_n else block_n
    # TODO(synk): ragged M / I tiles (pad or pl.cdiv + masked tail) not handled.
    assert M % tm == 0 and I % tn == 0

    grid = (M // tm, I // tn)

    out = pl.pallas_call(
        _intermediate_kernel,
        out_shape=jax.ShapeDtypeStruct((M, I), hidden_states.dtype),
        grid=grid,
        in_specs=[
            pl.BlockSpec((tm, H), lambda i, j: (i, 0)),   # activations
            pl.BlockSpec((H, tn), lambda i, j: (0, j)),   # weight (input-major)
            pl.BlockSpec((1, tn), lambda i, j: (0, j)),   # bias
        ],
        out_specs=pl.BlockSpec((tm, tn), lambda i, j: (i, j)),
        compiler_params=pltpu.CompilerParams(
            dimension_semantics=("parallel", "parallel")),
    )(x2, weight, b2)

    return out.reshape(B, S, I)


def _reference(hidden_states, weight, bias):
    """Pure-JAX reference mirroring the PyTorch forward (Linear + erf GELU)."""
    x = hidden_states.astype(jnp.float32)
    y = x @ weight.astype(jnp.float32) + bias.astype(jnp.float32)
    y = y * 0.5 * (1.0 + jax.scipy.special.erf(y * _INV_SQRT2))
    return y.astype(hidden_states.dtype)


if __name__ == "__main__":
    B, S, H = 2, 8, 32
    I = 4 * H  # intermediate_size = 4 * hidden_size (standard BERT ratio)

    key = jax.random.PRNGKey(0)
    k_x, k_w, k_b = jax.random.split(key, 3)

    hidden_states = jax.random.normal(k_x, (B, S, H), dtype=jnp.float32)
    # Scale so pre-activations span roughly [-3, 3] and exercise the GELU curve.
    weight = 0.2 * jax.random.normal(k_w, (H, I), dtype=jnp.float32)
    bias = 0.2 * jax.random.normal(k_b, (I,), dtype=jnp.float32)

    out = bert_intermediate(hidden_states, weight, bias)
    out = jax.block_until_ready(out)

    ref = _reference(hidden_states, weight, bias)
    assert out.shape == (B, S, I)
    assert jnp.allclose(out, ref, atol=1e-4, rtol=1e-4), "mismatch vs reference"

    print("KERNEL_OK")
</pallas_src>

<mosaic_0001>
module attributes {stable_mosaic.version = 11 : i64} {
  func.func @_intermediate_kernel(%arg0: i32, %arg1: i32, %arg2: memref<16x32xf32, #tpu.memory_space<vmem>>, %arg3: memref<32x128xf32, #tpu.memory_space<vmem>>, %arg4: memref<1x128xf32, #tpu.memory_space<vmem>>, %arg5: memref<16x128xf32, #tpu.memory_space<vmem>>) attributes {dimension_semantics = [#tpu.dimension_semantics<parallel>, #tpu.dimension_semantics<parallel>], iteration_bounds = array<i64: 1, 1>, scalar_prefetch = 0 : i64, scratch_operands = 0 : i64, tpu.core_type = #tpu.core_type<tc>, window_params = [{transform_indices = @transform_0, window_bounds = array<i64: 16, 32>}, {transform_indices = @transform_1, window_bounds = array<i64: 32, 128>}, {transform_indices = @transform_2, window_bounds = array<i64: 1, 128>}, {transform_indices = @transform_3, window_bounds = array<i64: 16, 128>}]} {
    %c0 = arith.constant 0 : index
    %c0_0 = arith.constant 0 : index
    %0 = vector.load %arg2[%c0, %c0_0] : memref<16x32xf32, #tpu.memory_space<vmem>>, vector<16x32xf32>
    %c0_1 = arith.constant 0 : index
    %c0_2 = arith.constant 0 : index
    %1 = vector.load %arg3[%c0_1, %c0_2] : memref<32x128xf32, #tpu.memory_space<vmem>>, vector<32x128xf32>
    %cst = arith.constant dense<0.000000e+00> : vector<16x128xf32>
    %2 = tpu.matmul %0, %1, %cst {dimension_numbers = #tpu.dot_dimension_numbers<[1], [0], [0], [1], [0, 0, 1, 1], [], []>} : vector<16x32xf32>, vector<32x128xf32>, vector<16x128xf32> -> vector<16x128xf32>
    %c0_3 = arith.constant 0 : index
    %c0_4 = arith.constant 0 : index
    %3 = vector.load %arg4[%c0_3, %c0_4] : memref<1x128xf32, #tpu.memory_space<vmem>>, vector<1x128xf32>
    %4 = vector.broadcast %3 : vector<1x128xf32> to vector<16x128xf32>
    %5 = arith.addf %2, %4 : vector<16x128xf32>
    %cst_5 = arith.constant 5.000000e-01 : f32
    %6 = vector.broadcast %cst_5 : f32 to vector<16x128xf32>
    %7 = arith.mulf %5, %6 : vector<16x128xf32>
    %cst_6 = arith.constant 0.707106769 : f32
    %8 = vector.broadcast %cst_6 : f32 to vector<16x128xf32>
    %9 = arith.mulf %5, %8 : vector<16x128xf32>
    %10 = math.absf %9 : vector<16x128xf32>
    %cst_7 = arith.constant 0.327591091 : f32
    %11 = vector.broadcast %cst_7 : f32 to vector<16x128xf32>
    %12 = arith.mulf %11, %10 : vector<16x128xf32>
    %cst_8 = arith.constant 1.000000e+00 : f32
    %13 = vector.broadcast %cst_8 : f32 to vector<16x128xf32>
    %14 = arith.addf %13, %12 : vector<16x128xf32>
    %cst_9 = arith.constant 1.000000e+00 : f32
    %15 = vector.broadcast %cst_9 : f32 to vector<16x128xf32>
    %16 = arith.divf %15, %14 : vector<16x128xf32>
    %cst_10 = arith.constant 1.06140542 : f32
    %17 = vector.broadcast %cst_10 : f32 to vector<16x128xf32>
    %18 = arith.mulf %16, %17 : vector<16x128xf32>
    %cst_11 = arith.constant -1.45315206 : f32
    %19 = vector.broadcast %cst_11 : f32 to vector<16x128xf32>
    %20 = arith.addf %19, %18 : vector<16x128xf32>
    %21 = arith.mulf %16, %20 : vector<16x128xf32>
    %cst_12 = arith.constant 1.42141378 : f32
    %22 = vector.broadcast %cst_12 : f32 to vector<16x128xf32>
    %23 = arith.addf %22, %21 : vector<16x128xf32>
    %24 = arith.mulf %16, %23 : vector<16x128xf32>
    %cst_13 = arith.constant -0.284496725 : f32
    %25 = vector.broadcast %cst_13 : f32 to vector<16x128xf32>
    %26 = arith.addf %25, %24 : vector<16x128xf32>
    %27 = arith.mulf %16, %26 : vector<16x128xf32>
    %cst_14 = arith.constant 0.254829586 : f32
    %28 = vector.broadcast %cst_14 : f32 to vector<16x128xf32>
    %29 = arith.addf %28, %27 : vector<16x128xf32>
    %30 = arith.mulf %16, %29 : vector<16x128xf32>
    %cst_15 = arith.constant 0.000000e+00 : f32
    %31 = vector.broadcast %cst_15 : f32 to vector<16x128xf32>
    %32 = arith.subf %31, %10 : vector<16x128xf32>
    %33 = arith.mulf %32, %10 : vector<16x128xf32>
    %34 = math.exp %33 : vector<16x128xf32>
    %35 = arith.mulf %30, %34 : vector<16x128xf32>
    %cst_16 = arith.constant 1.000000e+00 : f32
    %36 = vector.broadcast %cst_16 : f32 to vector<16x128xf32>
    %37 = arith.subf %36, %35 : vector<16x128xf32>
    %cst_17 = arith.constant 0.000000e+00 : f32
    %38 = vector.broadcast %cst_17 : f32 to vector<16x128xf32>
    %39 = arith.cmpf olt, %9, %38 : vector<16x128xf32>
    %cst_18 = arith.constant 0.000000e+00 : f32
    %40 = vector.broadcast %cst_18 : f32 to vector<16x128xf32>
    %41 = arith.subf %40, %37 : vector<16x128xf32>
    %42 = arith.select %39, %41, %37 : vector<16x128xi1>, vector<16x128xf32>
    %cst_19 = arith.constant 1.000000e+00 : f32
    %43 = vector.broadcast %cst_19 : f32 to vector<16x128xf32>
    %44 = arith.addf %43, %42 : vector<16x128xf32>
    %45 = arith.mulf %7, %44 : vector<16x128xf32>
    %c0_20 = arith.constant 0 : index
    %c0_21 = arith.constant 0 : index
    %46 = vector.load %arg5[%c0_20, %c0_21] : memref<16x128xf32, #tpu.memory_space<vmem>>, vector<16x128xf32>
    tpu.vector_store %arg5[%c0_20, %c0_21], %45 {strides = array<i32>} : memref<16x128xf32, #tpu.memory_space<vmem>>, vector<16x128xf32>,
    return
  }
  func.func @transform_0(%arg0: i32, %arg1: i32) -> (i32, i32) {
    %c0_i32 = arith.constant 0 : i32
    %c0_i32_0 = arith.constant 0 : i32
    return %arg0, %c0_i32 : i32, i32
  }
  func.func @transform_1(%arg0: i32, %arg1: i32) -> (i32, i32) {
    %c0_i32 = arith.constant 0 : i32
    %c0_i32_0 = arith.constant 0 : i32
    return %c0_i32, %arg1 : i32, i32
  }
  func.func @transform_2(%arg0: i32, %arg1: i32) -> (i32, i32) {
    %c0_i32 = arith.constant 0 : i32
    %c0_i32_0 = arith.constant 0 : i32
    return %c0_i32, %arg1 : i32, i32
  }
  func.func @transform_3(%arg0: i32, %arg1: i32) -> (i32, i32) {
    %c0_i32 = arith.constant 0 : i32
    return %arg0, %arg1 : i32, i32
  }
}

</mosaic_0001>

<bundles_post_ra>
// kernel: tpu_custom_call.1
= control target key start
LH: loop header
LB: loop body
LE: loop exit
PB: predicated region body
PF: predicated region fallthrough
CT: control target
= control target key end

     0   :  { %8 = vsyncpa [#allocation3], 0  ;;  %s398_s0 = inlined_call_operand.hbm [shape: f32[16,32], index: 0, kind: input, shape index: {}]   ;;  %s399_s1 = inlined_call_operand.hbm [shape: f32[32,128], index: 1, kind: input, shape index: {}]   ;;  %s400_s2 = inlined_call_operand.vmem [shape: f32[1,128], index: 2, kind: input, shape index: {}]   ;;  %s401_s3 = inlined_call_operand.hbm [shape: f32[16,128], index: 3, kind: output, shape index: {}]  }
   0x1   :  { %9 = vsyncpa [#allocation6], 0 }
   0x2   :  { %10 = vsyncpa [#allocation4], 0  ;;  %s325_s12 = smov [#allocation2]   ;;  %s253_s16 = scalar_lea.hbm %s398_s0, 256 }
   0x3   :  { %s16_s13 = sshll.u32 %s325_s12, 4  ;;  %p254_p0 = scmp.ne.s32.totalorder %s398_s0, %s253_s16  ;;  %s17_s13 = int_to_ptr.vmem [resolvable:$true] %s16_s13 }
   0x4   :  { %p257_p1 = scmp.lt.u32.totalorder %s253_s16, %s398_s0 }
   0x6   :  { %p259_p2 = pnand %p257_p1, %p254_p0 }
   0x8   :  { %262 = shalt.err (!%p259_p2)
}
   0x9   :  { %s263_s21 = scalar_lea.vmem %s17_s13, 256  ;;  %p268_p4 = scmp.lt.s32.totalorder %s17_s13, %s17_s13 }
   0xa   :  { %p264_p3 = scmp.ne.s32.totalorder %s17_s13, %s263_s21  ;;  %p269_p5 = scmp.lt.s32.totalorder %s263_s21, %s263_s21 }
   0xc   :  { %p270_p6 = por %p269_p5, %p268_p4 }
   0xe   :  { %p271_p7 = pnand %p270_p6, %p264_p3 }
  0x10   :  { %274 = shalt.err (!%p271_p7)
}
  0x11   :  { %s326_s22 = smov 128   ;;  %s327_s23 = smov 8  }
  0x12   :  { %22 = dma.hbm_to_vmem [thread:$0]  %s398_s0, 256, %s17_s13, [#allocation3], %s326_s22, %s326_s22, %s327_s23  }
  0x13   :  { %s328_s26 = smov [#allocation5]   ;;  %s275_s30 = scalar_lea.hbm %s399_s1, 512 }
  0x14   :  { %s28_s27 = sshll.u32 %s328_s26, 4  ;;  %p276_p8 = scmp.ne.s32.totalorder %s399_s1, %s275_s30  ;;  %s29_s27 = int_to_ptr.vmem [resolvable:$true] %s28_s27 }
  0x15   :  { %p279_p9 = scmp.lt.u32.totalorder %s275_s30, %s399_s1 }
  0x17   :  { %p281_p10 = pnand %p279_p9, %p276_p8 }
  0x19   :  { %284 = shalt.err (!%p281_p10)
}
  0x1a   :  { %s285_s8 = scalar_lea.vmem %s29_s27, 512  ;;  %p290_p12 = scmp.lt.s32.totalorder %s29_s27, %s29_s27 }
  0x1b   :  { %p286_p11 = scmp.ne.s32.totalorder %s29_s27, %s285_s8  ;;  %p291_p13 = scmp.lt.s32.totalorder %s285_s8, %s285_s8 }
  0x1d   :  { %p292_p0 = por %p291_p13, %p290_p12 }
  0x1f   :  { %p293_p1 = pnand %p292_p0, %p286_p11 }
  0x21   :  { %296 = shalt.err (!%p293_p1)
}
  0x22   :  { %34 = dma.hbm_to_vmem [thread:$0]  %s399_s1, 512, %s29_s27, [#allocation6], %s326_s22, %s326_s22, %s327_s23  }
  0x23   :  { %319 = dma.done.wait [#allocation3], 256  }
  0x24   :  { %320 = vsyncadd [#allocation3], 4294967040 }
  0x25   :  { %321 = dma.done.wait [#allocation6], 512  }
  0x26   :  { %322 = vsyncadd [#allocation6], 4294966784  ;;  %vm56_vm0 = vcmask 261120   ;;  %v45_v0 = vld [vmem:[#allocation5] sm:$0xff]  ;;  %v46_v1 = vld [vmem:[#allocation5 + $0x8] sm:$0xff] }
  0x27   :  { %v47_v2 = vld [vmem:[#allocation5 + $0x10] sm:$0xff]  ;;  %v232_v3 = vpack.c.bf16 %v46_v1, %v45_v0  ;;  %v48_v4 = vld [vmem:[#allocation5 + $0x18] sm:$0xff] }
  0x28   :  { %v43_v5 = vld [vmem:[#allocation2] sm:$0xff]  ;;  %v236_v6 = vpack.c.bf16 %v48_v4, %v47_v2  ;;  %v44_v7 = vld [vmem:[#allocation2 + $0x8] sm:$0xff] }
  0x29   :  { %229 = vmatprep.mubr.msk.f32.mxu0 %vm56_vm0, %v43_v5  ;;  %233 = vmatprep.subr.bf16.mxu0 %v232_v3  ;;  %v212_v8 = vld [vmem:[%s400_s2] ss:$0 sm:$0xff]  ;;  %s329_s2 = smov [#allocation7]  }
  0x2a   :  { %235 = vmatpush3.bf16.msra.mxu0 %v232_v3  ;;  %s199_s11 = sshll.u32 %s329_s2, 4  ;;  %s200_s11 = int_to_ptr.vmem [resolvable:$true] %s199_s11 }
  0x2b   :  { %237 = vmatprep.subr.bf16.mxu0 %v236_v6  ;;  %s297_s12 = scalar_lea.vmem %s200_s11, 256  ;;  %p302_p3 = scmp.lt.s32.totalorder %s200_s11, %s200_s11 }
  0x2c   :  { %p298_p2 = scmp.ne.s32.totalorder %s200_s11, %s297_s12  ;;  %p303_p4 = scmp.lt.s32.totalorder %s297_s12, %s297_s12 }
  0x2e   :  { %239 = vmatpush3.bf16.msra.mxu0 %v236_v6  ;;  %p304_p5 = por %p303_p4, %p302_p3 }
  0x30   :  { %p305_p6 = pnand %p304_p5, %p298_p2 }
  0x31   :  { %230 = vmatmul.mubr.msk.f32.vlgmr.msra.gmra.mrb[0].mxu0 %vm56_vm0, %v44_v7 }
 0x104   :  { %v231_v9 = vpop.f32.mrb[0].mxu0 }
 0x105   :  { %v135_v10 = vadd.f32 %v231_v9, %v212_v8  ;;  %v129_v11 = vpop.f32.mrb[1].mxu0 }
 0x106   :  { %v130_v12 = vadd.f32 %v212_v8, %v129_v11 }
 0x107   :  { %v141_v13 = vmul.f32 0.70710677, %v135_v10  ;;  %v139_v56 = vmul.f32 0.5, %v135_v10 }
 0x108   :  { %v140_v14 = vmul.f32 0.70710677, %v130_v12  ;;  %v138_v59 = vmul.f32 0.5, %v130_v12 }
 0x109   :  { %v143_v15 = vand.u32 2147483647, %v141_v13  ;;  %vm183_vm1 = vcmp.lt.f32.partialorder %v141_v13, 0.0 }
 0x10a   :  { %v142_v16 = vand.u32 2147483647, %v140_v14  ;;  %vm182_vm2 = vcmp.lt.f32.partialorder %v140_v14, 0.0 }
 0x10b   :  { %v145_v17 = vmul.f32 0.3275911, %v143_v15  ;;  %v171_v21 = vsub.f32 0.0, %v143_v15 }
 0x10c   :  { %v144_v18 = vmul.f32 0.3275911, %v142_v16  ;;  %v170_v22 = vsub.f32 0.0, %v142_v16 }
 0x10d   :  { %v147_v19 = vadd.f32 1.0, %v145_v17  ;;  %v173_v24 = vmul.f32 %v171_v21, %v143_v15 }
 0x10e   :  { %v146_v20 = vadd.f32 1.0, %v144_v18  ;;  %v172_v27 = vmul.f32 %v170_v22, %v142_v16 }
 0x10f   :  { %245 = vrcp.f32 %v147_v19  ;;  %v176_v30 = vmul.f32 1.442695, %v173_v24 }
 0x110   :  { %247 = vrcp.f32 %v146_v20  ;;  %v174_v33 = vmul.f32 1.442695, %v172_v27 }
 0x111   :  { %249 = vpow2.f32 %v176_v30 }
 0x112   :  { %251 = vpow2.f32 %v174_v33 }
 0x119   :  { %v246_v23 = vpop.eup %245 }
 0x11a   :  { %v248_v25 = vpop.eup %247  ;;  %v153_v26 = vmul.f32 1.0614054, %v246_v23 }
 0x11b   :  { %v152_v28 = vmul.f32 1.0614054, %v248_v25  ;;  %v250_v46 = vpop.eup %249 }
 0x11c   :  { %v155_v29 = vadd.f32 -1.4531521, %v153_v26  ;;  %v252_v48 = vpop.eup %251 }
 0x11d   :  { %v154_v31 = vadd.f32 -1.4531521, %v152_v28 }
 0x11e   :  { %v157_v32 = vmul.f32 %v246_v23, %v155_v29 }
 0x11f   :  { %v156_v34 = vmul.f32 %v248_v25, %v154_v31 }
 0x120   :  { %v159_v35 = vadd.f32 1.4214138, %v157_v32 }
 0x121   :  { %v158_v36 = vadd.f32 1.4214138, %v156_v34 }
 0x122   :  { %v161_v37 = vmul.f32 %v246_v23, %v159_v35 }
 0x123   :  { %v160_v38 = vmul.f32 %v248_v25, %v158_v36 }
 0x124   :  { %v163_v39 = vadd.f32 -0.28449672, %v161_v37 }
 0x125   :  { %v162_v40 = vadd.f32 -0.28449672, %v160_v38 }
 0x126   :  { %v165_v41 = vmul.f32 %v246_v23, %v163_v39 }
 0x127   :  { %v164_v42 = vmul.f32 %v248_v25, %v162_v40 }
 0x128   :  { %v167_v43 = vadd.f32 0.2548296, %v165_v41 }
 0x129   :  { %v166_v44 = vadd.f32 0.2548296, %v164_v42 }
 0x12a   :  { %v169_v45 = vmul.f32 %v246_v23, %v167_v43 }
 0x12b   :  { %v168_v47 = vmul.f32 %v248_v25, %v166_v44 }
 0x12c   :  { %v179_v49 = vmul.f32 %v250_v46, %v169_v45 }
 0x12d   :  { %v178_v50 = vmul.f32 %v252_v48, %v168_v47 }
 0x12e   :  { %v181_v51 = vsub.f32 1.0, %v179_v49 }
 0x12f   :  { %v180_v52 = vsub.f32 1.0, %v178_v50 }
 0x130   :  { %v185_v53 = vsub.f32 0.0, %v181_v51 }
 0x131   :  { %v184_v54 = vsub.f32 0.0, %v180_v52 }
 0x132   :  { %v187_v55 = vsel %vm183_vm1, %v185_v53, %v181_v51 }
 0x133   :  { %v189_v57 = vadd.f32 1.0, %v187_v55  ;;  %v186_v58 = vsel %vm182_vm2, %v184_v54, %v180_v52 }
 0x134   :  { %v188_v60 = vadd.f32 1.0, %v186_v58 }
 0x135   :  { %v191_v61 = vmul.f32 %v189_v57, %v139_v56 }
 0x136   :  { %v190_v62 = vmul.f32 %v188_v60, %v138_v59 }
 0x137   :  { %193 = vst [vmem:[#allocation7 + $0x8] sm:$0xff] %v191_v61 }
 0x138   :  { %192 = vst [vmem:[#allocation7] sm:$0xff] %v190_v62 }
 0x139   :  { %308 = shalt.err (!%p305_p6)
}
 0x13a   :  { %s309_s15 = scalar_lea.hbm %s401_s3, 256 }
 0x13b   :  { %p310_p7 = scmp.ne.s32.totalorder %s401_s3, %s309_s15  ;;  %p313_p8 = scmp.lt.u32.totalorder %s309_s15, %s401_s3 }
 0x13d   :  { %p315_p9 = pnand %p313_p8, %p310_p7 }
 0x13f   :  { %318 = shalt.err (!%p315_p9)
}
 0x140   :  { %205 = dma.vmem_to_hbm [thread:$0]  %s200_s11, 256, %s401_s3, [#allocation4], %s326_s22, %s326_s22, %s327_s23  }
 0x141   :  { %323 = dma.done.wait [#allocation4], 256  }
 0x142   :  { %324 = vsyncadd [#allocation4], 4294967040 }
 0x143   :  { %209 = vsyncpa [#allocation3], 1 }
 0x144   :  { %210 = vsyncpa [#allocation6], 1 }
 0x145   :  { %211 = vsyncpa [#allocation4], 1 }

</bundles_post_ra>
